<compile_context>
chip_gen: v5e
topology: v5e:2x2
jax: 0.10.0
libtpu: 0.0.40
codegen_flags: <defaults>
</compile_context>

<pallas_src>
import functools

import jax
import jax.numpy as jnp
from jax.experimental import pallas as pl
from jax.experimental.pallas import tpu as pltpu


def _round_up(x, m):
    return ((x + m - 1) // m) * m


def _discriminator_kernel(s_ref, a_ref, w1s_ref, w1a_ref, b1_ref, w2_ref,
                          b2_ref, o_ref, *, mxu_dtype):
    # Cast the activation tiles to the MXU dtype here (not in the wrapper) so
    # HBM only ever sees the original f32 stream once.
    s = s_ref[...].astype(mxu_dtype)
    a = a_ref[...].astype(mxu_dtype)
    # fc1 on the MXU:  cat([s, a]) @ W1  ==  s @ W1_s + a @ W1_a  (bf16 in, f32 acc)
    h = jnp.dot(s, w1s_ref[...], preferred_element_type=jnp.float32)
    h = h + jnp.dot(a, w1a_ref[...], preferred_element_type=jnp.float32)
    h = jnp.maximum(h + b1_ref[...], 0.0)                        # (TM, H) f32, VPU
    # fc2: an (TM,H)@(H,1) matmul would use 1 of 128+ MXU output lanes -> do the
    # H->1 contraction on the VPU/XLU instead.
    logit = jnp.sum(h * w2_ref[...], axis=-1, keepdims=True)     # (TM, 1) f32
    logit = logit + b2_ref[0]                                    # SMEM scalar bias
    # Stable sigmoid: clamp so exp(-logit) can never overflow to inf (the
    # clamp changes the result by < 1e-13 of true sigmoid at |logit| = 30).
    logit = jnp.clip(logit, -30.0, 30.0)
    prob = pl.reciprocal(1.0 + jnp.exp(-logit), approx=True)     # EUP exp + vrcp
    o_ref[...] = prob.astype(o_ref.dtype)


def discriminator_forward(state, action, w1, b1, w2, b2, *,
                          block_b=4096, mxu_dtype=jnp.bfloat16,
                          vmem_budget_bytes=32 * 1024 * 1024):
    """Forward pass of the GAIL Discriminator.

    state: (B, S)      action: (B, A)
    w1:    (S+A, H)    b1: (H,)     (fc1 weight stored as in_features x out_features)
    w2:    (H, 1)      b2: (1,)     (fc2)
    returns (B, 1) float32 probabilities.
    """
    B, S = state.shape
    _, A = action.shape
    in_dim, H = w1.shape
    assert in_dim == S + A, (in_dim, S, A)

    # Split W1 so the kernel never needs a concatenated (B, S+A) copy in HBM.
    # Weights are tiny and read once, so casting them here is essentially free.
    w1_s = w1[:S, :].astype(mxu_dtype)
    w1_a = w1[S:, :].astype(mxu_dtype)
    b1_row = b1.reshape(1, H).astype(jnp.float32)
    w2_row = w2.reshape(1, H).astype(jnp.float32)
    b2_vec = b2.reshape(1).astype(jnp.float32)

    # Activations stay in their original dtype (no wrapper-side cast pass).
    s_in = state
    a_in = action

    act_itemsize = jnp.dtype(state.dtype).itemsize
    mxu_itemsize = jnp.dtype(mxu_dtype).itemsize

    # --- VMEM-aware batch tile --------------------------------------------
    # Per-step residents (per batch row): double-buffered f32 input tiles,
    # the in-kernel bf16 copies, the (tm, H) f32 hidden intermediate and a
    # double-buffered output column.
    per_row_bytes = (2 * (S + A) * act_itemsize      # double-buffered input tiles
                     + (S + A) * mxu_itemsize        # in-kernel cast copies
                     + H * 4                         # f32 hidden h (dominant term)
                     + 2 * 4)                        # double-buffered output
    weight_bytes = 2 * (in_dim * H * mxu_itemsize + 2 * H * 4)   # pinned params (dbl-buf)
    usable = max(vmem_budget_bytes - weight_bytes - (2 << 20), 8 * per_row_bytes)
    tm_vmem_cap = max(8, (usable // per_row_bytes) // 8 * 8)

    b8 = _round_up(B, 8)
    tm = min(_round_up(block_b, 8), tm_vmem_cap, b8)
    # Ensure >= 2 grid steps whenever possible so "parallel" can shard the two
    # v7x TensorCores; a 1-step grid leaves the second core idle.
    if b8 > 8 and b8 // tm < 2:
        tm = _round_up(pl.cdiv(b8, 2), 8)
    b_pad = _round_up(B, tm)
    if b_pad != B:
        s_in = jnp.pad(s_in, ((0, b_pad - B), (0, 0)))
        a_in = jnp.pad(a_in, ((0, b_pad - B), (0, 0)))
    grid = (b_pad // tm,)

    # Explicit scoped-VMEM limit so large tiles compile on v5e (16 MiB default
    # scoped) and stay within v7x's 64 MiB physical VMEM.
    est_vmem = tm * per_row_bytes + weight_bytes
    vmem_limit = int(min(max(est_vmem * 5 // 4 + (2 << 20), 16 << 20), 56 << 20))

    cost = pl.CostEstimate(
        flops=2 * b_pad * (in_dim * H + H),
        transcendentals=b_pad,
        bytes_accessed=(b_pad * (S + A) * act_itemsize        # activations (read once)
                        + in_dim * H * mxu_itemsize           # W1
                        + (2 * H + 1) * 4                     # b1, w2, b2
                        + b_pad * 4),                         # output
    )

    kernel = functools.partial(_discriminator_kernel, mxu_dtype=mxu_dtype)

    out = pl.pallas_call(
        kernel,
        out_shape=jax.ShapeDtypeStruct((b_pad, 1), jnp.float32),
        grid=grid,
        in_specs=[
            pl.BlockSpec((tm, S), lambda i: (i, 0)),             # state tile (pipelined)
            pl.BlockSpec((tm, A), lambda i: (i, 0)),             # action tile (pipelined)
            pl.BlockSpec((S, H), lambda i: (0, 0)),              # W1_s, pinned in VMEM
            pl.BlockSpec((A, H), lambda i: (0, 0)),              # W1_a, pinned in VMEM
            pl.BlockSpec((1, H), lambda i: (0, 0)),              # b1,   pinned in VMEM
            pl.BlockSpec((1, H), lambda i: (0, 0)),              # w2^T, pinned in VMEM
            pl.BlockSpec(memory_space=pltpu.MemorySpace.SMEM),   # b2 scalar
        ],
        out_specs=pl.BlockSpec((tm, 1), lambda i: (i, 0)),
        compiler_params=pltpu.CompilerParams(
            dimension_semantics=("parallel",),
            vmem_limit_bytes=vmem_limit,
        ),
        cost_estimate=cost,
    )(s_in, a_in, w1_s, w1_a, b1_row, w2_row, b2_vec)
    return out[:B]


def init_params(key, state_dim, action_dim, hidden_dim):
    """Deterministic init mirroring nn.Linear's U(-1/sqrt(fan_in), 1/sqrt(fan_in))."""
    in_dim = state_dim + action_dim
    k1, k2, k3, k4 = jax.random.split(key, 4)
    lim1 = 1.0 / jnp.sqrt(in_dim)
    lim2 = 1.0 / jnp.sqrt(hidden_dim)
    w1 = jax.random.uniform(k1, (in_dim, hidden_dim), jnp.float32, -lim1, lim1)
    b1 = jax.random.uniform(k2, (hidden_dim,), jnp.float32, -lim1, lim1)
    w2 = jax.random.uniform(k3, (hidden_dim, 1), jnp.float32, -lim2, lim2)
    b2 = jax.random.uniform(k4, (1,), jnp.float32, -lim2, lim2)
    return w1, b1, w2, b2


def reference_forward(state, action, w1, b1, w2, b2):
    x = jnp.concatenate([state, action], axis=1)
    h = jnp.maximum(x @ w1 + b1, 0.0)
    return jax.nn.sigmoid(h @ w2 + b2)


if __name__ == "__main__":
    key = jax.random.PRNGKey(0)
    k_state, k_action, k_params = jax.random.split(key, 3)

    batch, state_dim, action_dim, hidden_dim = 64, 16, 8, 32

    state = jax.random.normal(k_state, (batch, state_dim), jnp.float32)
    action = jax.random.normal(k_action, (batch, action_dim), jnp.float32)
    w1, b1, w2, b2 = init_params(k_params, state_dim, action_dim, hidden_dim)

    # Default block_b: the >=2-step logic splits the padded batch into two
    # tiles, exercising the pipelined (and megacore-shardable) batch grid.
    fwd = jax.jit(functools.partial(discriminator_forward))
    out = jax.block_until_ready(fwd(state, action, w1, b1, w2, b2))

    assert out.shape == (batch, 1), out.shape

    # Reference with the same bf16 casts the kernel applies to its MXU operands.
    ref_bf16 = reference_forward(
        state.astype(jnp.bfloat16).astype(jnp.float32),
        action.astype(jnp.bfloat16).astype(jnp.float32),
        w1.astype(jnp.bfloat16).astype(jnp.float32), b1, w2, b2)
    # Pure-f32 reference (semantic check; bf16 MXU operands + approx reciprocal ~1e-3).
    ref_f32 = reference_forward(state, action, w1, b1, w2, b2)

    assert jnp.allclose(out, ref_bf16, atol=1e-2, rtol=1e-2), \
        float(jnp.max(jnp.abs(out - ref_bf16)))
    assert jnp.allclose(out, ref_f32, atol=2e-2, rtol=2e-2), \
        float(jnp.max(jnp.abs(out - ref_f32)))

    print("KERNEL_OK")
</pallas_src>

<mosaic_0001>
module attributes {stable_mosaic.version = 11 : i64} {
  func.func @_discriminator_kernel(%arg0: i32, %arg1: memref<32x16xf32, #tpu.memory_space<vmem>>, %arg2: memref<32x8xf32, #tpu.memory_space<vmem>>, %arg3: memref<16x32xbf16, #tpu.memory_space<vmem>>, %arg4: memref<8x32xbf16, #tpu.memory_space<vmem>>, %arg5: memref<1x32xf32, #tpu.memory_space<vmem>>, %arg6: memref<1x32xf32, #tpu.memory_space<vmem>>, %arg7: memref<1xf32, #tpu.memory_space<smem>>, %arg8: memref<32x1xf32, #tpu.memory_space<vmem>>) attributes {dimension_semantics = [#tpu.dimension_semantics<parallel>], iteration_bounds = array<i64: 2>, scalar_prefetch = 0 : i64, scratch_operands = 0 : i64, tpu.core_type = #tpu.core_type<tc>, window_params = [{transform_indices = @transform_0, window_bounds = array<i64: 32, 16>}, {transform_indices = @transform_1, window_bounds = array<i64: 32, 8>}, {pipeline_mode = #tpu.pipeline_mode<synchronous>, transform_indices = @transform_2, window_bounds = array<i64: 16, 32>}, {pipeline_mode = #tpu.pipeline_mode<synchronous>, transform_indices = @transform_3, window_bounds = array<i64: 8, 32>}, {pipeline_mode = #tpu.pipeline_mode<synchronous>, transform_indices = @transform_4, window_bounds = array<i64: 1, 32>}, {pipeline_mode = #tpu.pipeline_mode<synchronous>, transform_indices = @transform_5, window_bounds = array<i64: 1, 32>}, {transform_indices = @transform_6, window_bounds = array<i64: 1>}, {transform_indices = @transform_7, window_bounds = array<i64: 32, 1>}]} {
    %c0 = arith.constant 0 : index
    %c0_0 = arith.constant 0 : index
    %0 = vector.load %arg1[%c0, %c0_0] : memref<32x16xf32, #tpu.memory_space<vmem>>, vector<32x16xf32>
    %1 = arith.truncf %0 : vector<32x16xf32> to vector<32x16xbf16>
    %c0_1 = arith.constant 0 : index
    %c0_2 = arith.constant 0 : index
    %2 = vector.load %arg2[%c0_1, %c0_2] : memref<32x8xf32, #tpu.memory_space<vmem>>, vector<32x8xf32>
    %3 = arith.truncf %2 : vector<32x8xf32> to vector<32x8xbf16>
    %c0_3 = arith.constant 0 : index
    %c0_4 = arith.constant 0 : index
    %4 = vector.load %arg3[%c0_3, %c0_4] : memref<16x32xbf16, #tpu.memory_space<vmem>>, vector<16x32xbf16>
    %cst = arith.constant dense<0.000000e+00> : vector<32x32xf32>
    %5 = tpu.matmul %1, %4, %cst {dimension_numbers = #tpu.dot_dimension_numbers<[1], [0], [0], [1], [0, 0, 1, 1], [], []>} : vector<32x16xbf16>, vector<16x32xbf16>, vector<32x32xf32> -> vector<32x32xf32>
    %c0_5 = arith.constant 0 : index
    %c0_6 = arith.constant 0 : index
    %6 = vector.load %arg4[%c0_5, %c0_6] : memref<8x32xbf16, #tpu.memory_space<vmem>>, vector<8x32xbf16>
    %cst_7 = arith.constant dense<0.000000e+00> : vector<32x32xf32>
    %7 = tpu.matmul %3, %6, %cst_7 {dimension_numbers = #tpu.dot_dimension_numbers<[1], [0], [0], [1], [0, 0, 1, 1], [], []>} : vector<32x8xbf16>, vector<8x32xbf16>, vector<32x32xf32> -> vector<32x32xf32>
    %8 = arith.addf %5, %7 : vector<32x32xf32>
    %c0_8 = arith.constant 0 : index
    %c0_9 = arith.constant 0 : index
    %9 = vector.load %arg5[%c0_8, %c0_9] : memref<1x32xf32, #tpu.memory_space<vmem>>, vector<1x32xf32>
    %10 = vector.broadcast %9 : vector<1x32xf32> to vector<32x32xf32>
    %11 = arith.addf %8, %10 : vector<32x32xf32>
    %cst_10 = arith.constant 0.000000e+00 : f32
    %12 = vector.broadcast %cst_10 : f32 to vector<32x32xf32>
    %13 = arith.maximumf %11, %12 : vector<32x32xf32>
    %c0_11 = arith.constant 0 : index
    %c0_12 = arith.constant 0 : index
    %14 = vector.load %arg6[%c0_11, %c0_12] : memref<1x32xf32, #tpu.memory_space<vmem>>, vector<1x32xf32>
    %15 = vector.broadcast %14 : vector<1x32xf32> to vector<32x32xf32>
    %16 = arith.mulf %13, %15 : vector<32x32xf32>
    %cst_13 = arith.constant dense<0.000000e+00> : vector<32xf32>
    %17 = vector.multi_reduction <add>, %16, %cst_13 [1] : vector<32x32xf32> to vector<32xf32>
    %18 = vector.shape_cast %17 : vector<32xf32> to vector<32x1xf32>
    %c0_14 = arith.constant 0 : index
    %19 = memref.load %arg7[%c0_14] : memref<1xf32, #tpu.memory_space<smem>>
    %20 = vector.broadcast %19 : f32 to vector<32x1xf32>
    %21 = arith.addf %18, %20 : vector<32x1xf32>
    %cst_15 = arith.constant -3.000000e+01 : f32
    %cst_16 = arith.constant 3.000000e+01 : f32
    %22 = vector.broadcast %cst_15 : f32 to vector<32x1xf32>
    %23 = arith.maximumf %22, %21 : vector<32x1xf32>
    %24 = vector.broadcast %cst_16 : f32 to vector<32x1xf32>
    %25 = arith.minimumf %24, %23 : vector<32x1xf32>
    %cst_17 = arith.constant 0.000000e+00 : f32
    %26 = vector.broadcast %cst_17 : f32 to vector<32x1xf32>
    %27 = arith.subf %26, %25 : vector<32x1xf32>
    %28 = math.exp %27 : vector<32x1xf32>
    %cst_18 = arith.constant 1.000000e+00 : f32
    %29 = vector.broadcast %cst_18 : f32 to vector<32x1xf32>
    %30 = arith.addf %29, %28 : vector<32x1xf32>
    %31 = tpu.reciprocal %30 {approx = true} : vector<32x1xf32> -> vector<32x1xf32>
    %c0_19 = arith.constant 0 : index
    %c0_20 = arith.constant 0 : index
    %32 = vector.load %arg8[%c0_19, %c0_20] : memref<32x1xf32, #tpu.memory_space<vmem>>, vector<32x1xf32>
    tpu.vector_store %arg8[%c0_19, %c0_20], %31 {strides = array<i32>} : memref<32x1xf32, #tpu.memory_space<vmem>>, vector<32x1xf32>,
    return
  }
  func.func @transform_0(%arg0: i32) -> (i32, i32) {
    %c0_i32 = arith.constant 0 : i32
    %c0_i32_0 = arith.constant 0 : i32
    return %arg0, %c0_i32 : i32, i32
  }
  func.func @transform_1(%arg0: i32) -> (i32, i32) {
    %c0_i32 = arith.constant 0 : i32
    %c0_i32_0 = arith.constant 0 : i32
    return %arg0, %c0_i32 : i32, i32
  }
  func.func @transform_2(%arg0: i32) -> (i32, i32) {
    %c0_i32 = arith.constant 0 : i32
    %c0_i32_0 = arith.constant 0 : i32
    %c0_i32_1 = arith.constant 0 : i32
    return %c0_i32, %c0_i32_0 : i32, i32
  }
  func.func @transform_3(%arg0: i32) -> (i32, i32) {
    %c0_i32 = arith.constant 0 : i32
    %c0_i32_0 = arith.constant 0 : i32
    %c0_i32_1 = arith.constant 0 : i32
    return %c0_i32, %c0_i32_0 : i32, i32
  }
  func.func @transform_4(%arg0: i32) -> (i32, i32) {
    %c0_i32 = arith.constant 0 : i32
    %c0_i32_0 = arith.constant 0 : i32
    %c0_i32_1 = arith.constant 0 : i32
    return %c0_i32, %c0_i32_0 : i32, i32
  }
  func.func @transform_5(%arg0: i32) -> (i32, i32) {
    %c0_i32 = arith.constant 0 : i32
    %c0_i32_0 = arith.constant 0 : i32
    %c0_i32_1 = arith.constant 0 : i32
    return %c0_i32, %c0_i32_0 : i32, i32
  }
  func.func @transform_6(%arg0: i32) -> i32 {
    %c0_i32 = arith.constant 0 : i32
    %c0_i32_0 = arith.constant 0 : i32
    return %c0_i32 : i32
  }
  func.func @transform_7(%arg0: i32) -> (i32, i32) {
    %c0_i32 = arith.constant 0 : i32
    %c0_i32_0 = arith.constant 0 : i32
    return %arg0, %c0_i32 : i32, i32
  }
}

</mosaic_0001>

<bundles_post_ra>
// kernel: discriminator_forward.1
= control target key start
LH: loop header
LB: loop body
LE: loop exit
PB: predicated region body
PF: predicated region fallthrough
CT: control target
= control target key end

     0   :  { %s628_s26 = smov 0   ;;  %s673_s0 = inlined_call_operand.vmem [shape: f32[64,16], index: 0, kind: input, shape index: {}]   ;;  %s674_s1 = inlined_call_operand.vmem [shape: f32[64,8], index: 1, kind: input, shape index: {}]   ;;  %s675_s2 = inlined_call_operand.vmem [shape: bf16[16,32], index: 2, kind: input, shape index: {}]   ;;  %s676_s3 = inlined_call_operand.vmem [shape: bf16[8,32], index: 3, kind: input, shape index: {}]   ;;  %s677_s4 = inlined_call_operand.vmem [shape: f32[1,32], index: 4, kind: input, shape index: {}]   ;;  %s678_s5 = inlined_call_operand.vmem [shape: f32[1,32], index: 5, kind: input, shape index: {}]   ;;  %s679_s6 = inlined_call_operand.<no memory space> [shape: f32[1], index: 6, kind: input, shape index: {}]   ;;  %s680_s7 = inlined_call_operand.vmem [shape: f32[64,1], index: 7, kind: output, shape index: {}]  }
   0x1   :  { %12 = sst [smem:[#allocation2]] %s679_s6 }
   0x2 LB: > { %s523_s27 = sadd.s32 4294967295, %s583_s26   ;;  %p527_p0 = scmp.ge.s32.totalorder %s583_s26, 1  ;;  %s583_s26 = sphi %s628_s26, %s18_s26  }
   0x3   : > { %p250_p1 = scmp.lt.s32.totalorder %s583_s26, 3 }
   0x5   : > { %p251_p2 = pnand %p527_p0, %p250_p1 }
   0x6   : > { %s528_s8 = sshll.u32 (!%p251_p2), %s523_s27, 2  ;;  %s416_s20 = sld [smem:[#allocation2]] (!%p251_p2) }
   0x7   : > { %254 = sbr.rel (%p251_p2) target bundleno = 310 (0x136), region = 48  ;;  %p288_p3 = scmp.lt.s32.totalorder (!%p251_p2), %s528_s8, 7 }
   0xc   : > { %v320_v0 = vld [vmem:[%s676_s3] sm:$0xf]  ;;  %vm328_vm0 = vcmask 1043456   ;;  %s682_s8 = smov (!%p288_p3, %s528_s8), 7  ;;  %vm321_vm1 = vcmask 64512   ;;  %vm357_vm2 = vcmask 130048   ;;  %v417_v45 = vstv %s416_s20 }
   0xd   : > { %v548_v1 = vld [vmem:[%s675_s2] sm:$0xff]  ;;  %v330_v2 = vsel %vm328_vm0, %v320_v0, 0  ;;  %s642_s9 = sshll.u32 %s682_s8, 3  ;;  %vm403_vm3 = vcmask 261120   ;;  %vm450_vm4 = vcmask 7168  }
   0xe   : > { %339 = vmatpush.bf16.msra.mxu0 %v330_v2  ;;  %549 = vmatpush.bf16.msra.mxu2 %v330_v2  ;;  %s297_s12 = scalar_lea.vmem %s674_s1, %s642_s9  ;;  %s291_s15 = scalar_lea.vmem %s673_s0, %s642_s9  ;;  %v559_v16 = vld [vmem:[%s677_s4] ss:$0 sm:$0xff] }
   0xf   : > { %371 = vmatpush.bf16.msra.mxu1 %v548_v1  ;;  %550 = vmatpush.bf16.msra.mxu3 %v548_v1  ;;  %v312_v3 = vld [vmem:[%s297_s12] sm:$0xff]  ;;  %v313_v4 = vld [vmem:[%s297_s12 + $0x8] sm:$0xff]  ;;  %v314_v5 = vld [vmem:[%s297_s12 + $0x10] sm:$0xff]  ;;  %s303_s23 = scalar_lea.vmem %s680_s7, %s642_s9 }
  0x10   : > { %v316_v6 = vpack.c.bf16 %v313_v4, %v312_v3  ;;  %v315_v7 = vld [vmem:[%s297_s12 + $0x18] sm:$0xff]  ;;  %v306_v8 = vld [vmem:[%s291_s15] sm:$0xff]  ;;  %v307_v9 = vld [vmem:[%s291_s15 + $0x8] sm:$0xff] }
  0x11   : > { %v317_v10 = vpack.c.bf16 %v315_v7, %v314_v5  ;;  %v310_v11 = vpack.c.bf16 %v307_v9, %v306_v8  ;;  %v308_v12 = vld [vmem:[%s291_s15 + $0x10] sm:$0xff]  ;;  %v309_v13 = vld [vmem:[%s291_s15 + $0x18] sm:$0xff]  ;;  %v560_v20 = vld [vmem:[%s678_s5] ss:$0 sm:$0xff] }
  0x12   : > { %534 = vmatmul.msk.bf16.vlgmr.msra.gmra.mxu0 %vm321_vm1, %v316_v6  ;;  %v311_v14 = vpack.c.bf16 %v309_v13, %v308_v12 }
  0x13   : > { %535 = vmatmul.msk.bf16.vlgmr.msra.gmra.mxu2 %vm321_vm1, %v317_v10  ;;  %540 = vmatmul.msk.bf16.vlgmr.msra.gmra.mxu1 %vm357_vm2, %v310_v11 }
  0x14   : > { %541 = vmatmul.msk.bf16.vlgmr.msra.gmra.mxu3 %vm357_vm2, %v311_v14 }
  0x8f   : > { %v341_v15 = vpop.f32.mrf.mxu0 }
  0x90   : > { %v373_v17 = vpop.f32.mrf.mxu1 }
  0x91   : > { %v374_v18 = vadd.f32 %v373_v17, %v341_v15 }
  0x93   : > { %v387_v19 = vadd.f32 %v559_v16, %v374_v18 }
  0x95   : > { %v391_v21 = vmax.f32 %v387_v19, 0.0 }
  0x96   : > { %v346_v22 = vpop.f32.mrf.mxu2 }
  0x97   : > { %v378_v23 = vpop.f32.mrf.mxu3  ;;  %v343_v24 = vpop.f32.mrf.mxu0  ;;  %v399_v25 = vmul.f32 %v560_v20, %v391_v21 }
  0x98   : > { %v379_v26 = vadd.f32 %v378_v23, %v346_v22  ;;  %v375_v27 = vpop.f32.mrf.mxu1 }
  0x99   : > { %v376_v28 = vadd.f32 %v375_v27, %v343_v24  ;;  %v404_v29 = vsel %vm403_vm3, %v399_v25, 0.0 }
  0x9a   : > { %v389_v30 = vadd.f32 %v559_v16, %v379_v26  ;;  %405 = vadd.xlane.f32.xlu0 %v404_v29 }
  0x9b   : > { %v388_v31 = vadd.f32 %v559_v16, %v376_v28 }
  0x9c   : > { %v393_v32 = vmax.f32 %v389_v30, 0.0 }
  0x9d   : > { %v392_v33 = vmax.f32 %v388_v31, 0.0 }
  0x9e   : > { %v348_v34 = vpop.f32.mrf.mxu2  ;;  %v401_v35 = vmul.f32 %v560_v20, %v393_v32 }
  0x9f   : > { %v380_v36 = vpop.f32.mrf.mxu3  ;;  %v400_v37 = vmul.f32 %v560_v20, %v392_v33 }
  0xa0   : > { %v381_v38 = vadd.f32 %v380_v36, %v348_v34  ;;  %v410_v39 = vsel %vm403_vm3, %v401_v35, 0.0 }
  0xa1   : > { %411 = vadd.xlane.f32.xlu1 %v410_v39  ;;  %v407_v40 = vsel %vm403_vm3, %v400_v37, 0.0 }
  0xa2   : > { %v390_v41 = vadd.f32 %v559_v16, %v381_v38  ;;  %408 = vadd.xlane.f32.xlu0 %v407_v40 }
  0xa4   : > { %v394_v42 = vmax.f32 %v390_v41, 0.0 }
  0xa6   : > { %v402_v43 = vmul.f32 %v560_v20, %v394_v42 }
  0xa8   : > { %v413_v44 = vsel %vm403_vm3, %v402_v43, 0.0 }
  0xa9   : > { %414 = vadd.xlane.f32.xlu1 %v413_v44 }
 0x10d   : > { %v406_v46 = vpop.xlane.xlu0 %405 }
 0x10e   : > { %v418_v47 = vadd.f32 %v417_v45, %v406_v46 }
 0x110   : > { %v542_v48 = vclamps-f32 %v418_v47, 30.0 }
 0x112   : > { %v430_v49 = vsub.f32 0.0, %v542_v48 }
 0x114   : > { %v434_v50 = vmul.f32 1.442695, %v430_v49  ;;  %v412_v51 = vpop.xlane.xlu1 %411 }
 0x115   : > { %v420_v52 = vadd.f32 %v417_v45, %v412_v51  ;;  %v409_v53 = vpop.xlane.xlu0 %408 }
 0x116   : > { %561 = vpow2.f32 %v434_v50  ;;  %v419_v54 = vadd.f32 %v417_v45, %v409_v53 }
 0x117   : > { %v544_v55 = vclamps-f32 %v420_v52, 30.0 }
 0x118   : > { %v543_v56 = vclamps-f32 %v419_v54, 30.0 }
 0x119   : > { %v432_v57 = vsub.f32 0.0, %v544_v55 }
 0x11a   : > { %v431_v58 = vsub.f32 0.0, %v543_v56 }
 0x11b   : > { %v438_v59 = vmul.f32 1.442695, %v432_v57 }
 0x11c   : > { %v562_v60 = vpop.eup %561  ;;  %v436_v61 = vmul.f32 1.442695, %v431_v58  ;;  %v415_v62 = vpop.xlane.xlu1 %414 }
 0x11d   : > { %v442_v63 = vadd.f32 1.0, %v562_v60  ;;  %563 = vpow2.f32 %v438_v59  ;;  %v421_v0 = vadd.f32 %v417_v45, %v415_v62 }
 0x11e   : > { %565 = vpow2.f32 %v436_v61 }
 0x11f   : > { %567 = vrcp.f32 %v442_v63  ;;  %v545_v1 = vclamps-f32 %v421_v0, 30.0 }
 0x121   : > { %v433_v2 = vsub.f32 0.0, %v545_v1 }
 0x123   : > { %v564_v3 = vpop.eup %563  ;;  %v440_v4 = vmul.f32 1.442695, %v433_v2 }
 0x124   : > { %v566_v5 = vpop.eup %565  ;;  %v444_v6 = vadd.f32 1.0, %v564_v3 }
 0x125   : > { %v568_v7 = vpop.eup %567  ;;  %v443_v8 = vadd.f32 1.0, %v566_v5  ;;  %569 = vpow2.f32 %v440_v4 }
 0x126   : > { %451 = vst.msk [vmem:[%s303_s23] sm:$0xff] %vm450_vm4, %v568_v7 }
 0x127   : > { %571 = vrcp.f32 %v443_v8 }
 0x128   : > { %573 = vrcp.f32 %v444_v6 }
 0x12b   : > { %v570_v9 = vpop.eup %569 }
 0x12c   : > { %v445_v10 = vadd.f32 1.0, %v570_v9 }
 0x12d   : > { %v572_v11 = vpop.eup %571 }
 0x12e   : > { %v574_v12 = vpop.eup %573  ;;  %452 = vst.msk [vmem:[%s303_s23 + $0x8] sm:$0xff] %vm450_vm4, %v572_v11  ;;  %575 = vrcp.f32 %v445_v10 }
 0x12f   : > { %453 = vst.msk [vmem:[%s303_s23 + $0x10] sm:$0xff] %vm450_vm4, %v574_v12 }
 0x134   : > { %v576_v13 = vpop.eup %575 }
 0x135   : > { %454 = vst.msk [vmem:[%s303_s23 + $0x18] sm:$0xff] %vm450_vm4, %v576_v13 }
 0x136 PF: > { %s18_s26 = sadd.s32 1, %s583_s26  }
 0x137   : > { %p15_p4 = scmp.ge.s32.totalorder %s18_s26, 4  }
 0x139   :  { %17 = sbr.rel (!%p15_p4) target bundleno = 2 (0x2), region = 81 }

</bundles_post_ra>
